<compile_context>
chip_gen: v7x
topology: tpu7x:2x2x1
jax: 0.10.0
libtpu: 0.0.40
codegen_flags: <defaults>
</compile_context>

<pallas_src>
import jax
import jax.numpy as jnp
from jax.experimental import pallas as pl
from jax.experimental.pallas import tpu as pltpu

EPS = 1e-5
RELU6_MAX = 6.0


def _vmem_limit_bytes():
    """~75% of physical per-core VMEM (v5e/v6e: 128 MiB, v7x: 64 MiB)."""
    try:
        cap = pltpu.get_tpu_info().vmem_capacity_bytes
        return int(cap * 3 // 4)
    except Exception:
        return 48 * 1024 * 1024  # conservative fallback, safe on every gen


def _col_select(w, wo, s):
    """(w, wo) one-hot matrix selecting every s-th column.

    Strided downsample expressed as a tiny matmul so every in-kernel memory
    access stays a contiguous slice (robust on all generations)."""
    return (jnp.arange(w)[:, None] == s * jnp.arange(wo)[None, :]).astype(
        jnp.float32)


def _row_select(n, h, ho, s):
    """(n*ho, n*h) block-diagonal one-hot selecting every s-th row per image."""
    rows = jnp.arange(n * ho)
    cols = (rows // ho) * h + s * (rows % ho)
    return (jnp.arange(n * h)[None, :] == cols[:, None]).astype(jnp.float32)


def _dw_bn_relu6_kernel(stride, n, h, w, ho, wo):
    """One grid step = one input channel: in-kernel ZeroPad2d(1), depthwise
    3x3 conv (stride s), training-mode BatchNorm, ReLU6."""
    s = stride

    def kernel(*refs):
        if s == 1:
            x_ref, wdw_ref, g1_ref, b1_ref, y_ref, pad_ref = refs
            selw_ref = selh_ref = None
        else:
            (x_ref, wdw_ref, g1_ref, b1_ref, selw_ref, selh_ref,
             y_ref, pad_ref) = refs

        c = pl.program_id(0)

        # ---- ZeroPad2d(1) folded into the kernel: zeroed VMEM scratch +
        # interior copy (no host-side jnp.pad / phase-split passes).
        pad_ref[...] = jnp.zeros_like(pad_ref)
        pad_ref[:, 1:h + 1, 1:w + 1] = x_ref[:, 0, :, :]

        # ---- depthwise 3x3 at stride 1 from contiguous static slices.
        # One vector MAC per tap over this channel's whole (n, h, w) slab; the
        # nine per-channel weights are scalar SMEM reads (splat + vmul).
        # Cross-channel parallelism comes from the grid, not a Python loop.
        acc = None
        for kh in range(3):
            for kw in range(3):
                tap = pad_ref[:, kh:kh + h, kw:kw + w]
                term = tap * wdw_ref[c, kh * 3 + kw]
                acc = term if acc is None else acc + term

        if s == 1:
            y = acc                                            # (n, h, w)
        else:
            # Stride handled in-kernel with two tiny one-hot selection matmuls
            # (MXU, exact).  TODO(synk): strided ref reads / strided DMA to
            # skip the discarded stride-1 outputs entirely.
            y2 = jnp.dot(acc.reshape(n * h, w), selw_ref[...],
                         preferred_element_type=jnp.float32)   # (n*h, wo)
            y = jnp.dot(selh_ref[...], y2,
                        preferred_element_type=jnp.float32)    # (n*ho, wo)

        # ---- BatchNorm_1 (training-mode batch stats over this channel's full
        # N*H*W extent, biased variance) + ReLU6.  Two-pass centered variance
        # for numerical robustness at large reductions.
        inv_p = 1.0 / float(n * ho * wo)
        mean = jnp.sum(y, keepdims=True) * inv_p
        d = y - mean
        var = jnp.sum(d * d, keepdims=True) * inv_p
        scale = g1_ref[c] * jax.lax.rsqrt(var + EPS)
        yn = jnp.clip(d * scale + b1_ref[c], 0.0, RELU6_MAX)

        if s == 1:
            y_ref[0] = yn
        else:
            for b in range(n):                                 # (n*ho,wo)->(n,ho,wo)
                y_ref[0, b] = yn[b * ho:(b + 1) * ho, :]

    return kernel


def _pw_bn_relu6_kernel(cin, n, ho, wo):
    """One grid step = one output channel: 1x1 conv (bias), training-mode
    BatchNorm, ReLU6.  VPU broadcast-MACs: cin/cout here are far too small for
    the MXU (worthwhile only around >=128 ch on v5e, ~256 on v6e/v7x)."""

    def kernel(y_ref, wpw_ref, bpw_ref, g2_ref, b2_ref, out_ref):
        co = pl.program_id(0)

        acc = None
        for ci in range(cin):
            term = y_ref[ci] * wpw_ref[co, ci]
            acc = term if acc is None else acc + term
        z = acc + bpw_ref[co]                                  # (n, ho, wo)

        inv_p = 1.0 / float(n * ho * wo)
        mean = jnp.sum(z, keepdims=True) * inv_p
        d = z - mean
        var = jnp.sum(d * d, keepdims=True) * inv_p
        scale = g2_ref[co] * jax.lax.rsqrt(var + EPS)
        out_ref[:, 0, :, :] = jnp.clip(d * scale + b2_ref[co], 0.0, RELU6_MAX)

    return kernel


def depthwise_block_forward(x_nchw, params, *, stride):
    """NCHW in, NCHW out (matches the PyTorch module's forward)."""
    w_dw, g1, b1, w_pw, b_pw, g2, b2 = params
    n, cin, h, w = x_nchw.shape
    cout = w_pw.shape[0]
    s = stride
    ho = (h + 2 - 3) // s + 1
    wo = (w + 2 - 3) // s + 1

    x = x_nchw.astype(jnp.float32)
    wdw = w_dw.reshape(cin, 9).astype(jnp.float32)       # [c, kh*3+kw]
    wpw = w_pw.reshape(cout, cin).astype(jnp.float32)    # [co, ci]
    g1f, b1f = g1.astype(jnp.float32), b1.astype(jnp.float32)
    bpwf = b_pw.astype(jnp.float32)
    g2f, b2f = g2.astype(jnp.float32), b2.astype(jnp.float32)

    vmem_budget = _vmem_limit_bytes()
    smem = pl.BlockSpec(memory_space=pltpu.MemorySpace.SMEM)
    cparams = pltpu.CompilerParams(
        dimension_semantics=("parallel",),   # megacore sharding on v7x
        vmem_limit_bytes=vmem_budget,
    )

    # ---- stage 1: depthwise 3x3 + BN_1 + ReLU6; grid over input channels.
    # Each block holds the channel's full N*H*W extent -> exact BN stats,
    # pipelined per-channel DMAs, parallel across TensorCores.
    a_in_specs = [
        pl.BlockSpec((n, 1, h, w), lambda c: (0, c, 0, 0)),
        smem, smem, smem,
    ]
    a_inputs = [x, wdw, g1f, b1f]
    if s > 1:
        selw = _col_select(w, wo, s)          # (w, wo)
        selh = _row_select(n, h, ho, s)       # (n*ho, n*h)
        a_in_specs += [
            pl.BlockSpec((w, wo), lambda c: (0, 0)),
            pl.BlockSpec((n * ho, n * h), lambda c: (0, 0)),
        ]
        a_inputs += [selw, selh]

    y = pl.pallas_call(
        _dw_bn_relu6_kernel(s, n, h, w, ho, wo),
        grid=(cin,),
        out_shape=jax.ShapeDtypeStruct((cin, n, ho, wo), jnp.float32),
        in_specs=a_in_specs,
        out_specs=pl.BlockSpec((1, n, ho, wo), lambda c: (c, 0, 0, 0)),
        scratch_shapes=[pltpu.VMEM((n, h + 2, w + 2), jnp.float32)],
        compiler_params=cparams,
    )(*a_inputs)

    # ---- stage 2: 1x1 conv + BN_2 + ReLU6; grid over output channels.
    # y's BlockSpec maps every step to the same full block, so it is DMA'd in
    # once and stays resident across the grid.
    out = pl.pallas_call(
        _pw_bn_relu6_kernel(cin, n, ho, wo),
        grid=(cout,),
        out_shape=jax.ShapeDtypeStruct((n, cout, ho, wo), jnp.float32),
        in_specs=[
            pl.BlockSpec((cin, n, ho, wo), lambda co: (0, 0, 0, 0)),
            smem, smem, smem, smem,
        ],
        out_specs=pl.BlockSpec((n, 1, ho, wo), lambda co: (0, co, 0, 0)),
        compiler_params=cparams,
    )(y, wpw, bpwf, g2f, b2f)

    return out  # NCHW, no host-side transpose needed


def depthwise_block_reference(x_nchw, params, *, stride):
    """Pure-JAX reference (NCHW), mirrors the PyTorch forward."""
    w_dw, g1, b1, w_pw, b_pw, g2, b2 = params
    cin = x_nchw.shape[1]
    xp = jnp.pad(x_nchw, ((0, 0), (0, 0), (1, 1), (1, 1)))
    y = jax.lax.conv_general_dilated(
        xp, w_dw, window_strides=(stride, stride), padding='VALID',
        dimension_numbers=('NCHW', 'OIHW', 'NCHW'),
        feature_group_count=cin, precision=jax.lax.Precision.HIGHEST)

    def bn(t, g, b):
        m = jnp.mean(t, axis=(0, 2, 3), keepdims=True)
        v = jnp.mean((t - m) ** 2, axis=(0, 2, 3), keepdims=True)
        return ((t - m) / jnp.sqrt(v + EPS)) * g.reshape(1, -1, 1, 1) \
            + b.reshape(1, -1, 1, 1)

    y = jnp.clip(bn(y, g1, b1), 0.0, 6.0)
    z = jax.lax.conv_general_dilated(
        y, w_pw, window_strides=(1, 1), padding='VALID',
        dimension_numbers=('NCHW', 'OIHW', 'NCHW'),
        precision=jax.lax.Precision.HIGHEST) + b_pw.reshape(1, -1, 1, 1)
    z = jnp.clip(bn(z, g2, b2), 0.0, 6.0)
    return z


if __name__ == "__main__":
    key = jax.random.PRNGKey(0)
    N, CIN, COUT, H, W = 2, 4, 8, 16, 16
    ks = jax.random.split(key, 8)

    x = jax.random.normal(ks[0], (N, CIN, H, W), jnp.float32)
    # deterministic synthetic parameters (shapes from the module __init__)
    w_dw = 0.3 * jax.random.normal(ks[1], (CIN, 1, 3, 3), jnp.float32)     # DW weight
    g1 = 1.0 + 0.1 * jax.random.normal(ks[2], (CIN,), jnp.float32)         # BN_1 gamma
    b1 = 0.1 * jax.random.normal(ks[3], (CIN,), jnp.float32)               # BN_1 beta
    w_pw = 0.3 * jax.random.normal(ks[4], (COUT, CIN, 1, 1), jnp.float32)  # 1x1 weight
    b_pw = 0.1 * jax.random.normal(ks[5], (COUT,), jnp.float32)            # 1x1 bias
    g2 = 1.0 + 0.1 * jax.random.normal(ks[6], (COUT,), jnp.float32)        # BN_2 gamma
    b2 = 0.1 * jax.random.normal(ks[7], (COUT,), jnp.float32)              # BN_2 beta
    params = (w_dw, g1, b1, w_pw, b_pw, g2, b2)

    for stride in (1, 2):
        out = jax.block_until_ready(
            depthwise_block_forward(x, params, stride=stride))
        ref = depthwise_block_reference(x, params, stride=stride)
        assert out.shape == ref.shape, (out.shape, ref.shape)
        max_err = float(jnp.max(jnp.abs(out - ref)))
        assert jnp.allclose(out, ref, atol=2e-3, rtol=2e-3), \
            f"mismatch at stride={stride}: max abs err {max_err}"

    print("KERNEL_OK")
</pallas_src>

<mosaic_0001>
module attributes {stable_mosaic.version = 11 : i64} {
  func.func @kernel(%arg0: i32, %arg1: memref<2x1x16x16xf32, #tpu.memory_space<vmem>>, %arg2: memref<4x9xf32, #tpu.memory_space<smem>>, %arg3: memref<4xf32, #tpu.memory_space<smem>>, %arg4: memref<4xf32, #tpu.memory_space<smem>>, %arg5: memref<1x2x16x16xf32, #tpu.memory_space<vmem>>, %arg6: memref<2x18x18xf32, #tpu.memory_space<vmem>>) attributes {dimension_semantics = [#tpu.dimension_semantics<parallel>], iteration_bounds = array<i64: 4>, scalar_prefetch = 0 : i64, scratch_operands = 1 : i64, tpu.core_type = #tpu.core_type<tc>, window_params = [{transform_indices = @transform_0, window_bounds = array<i64: 2, 1, 16, 16>}, {transform_indices = @transform_1, window_bounds = array<i64: 4, 9>}, {transform_indices = @transform_2, window_bounds = array<i64: 4>}, {transform_indices = @transform_3, window_bounds = array<i64: 4>}, {transform_indices = @transform_4, window_bounds = array<i64: 1, 2, 16, 16>}]} {
    %cst = arith.constant 0.000000e+00 : f32
    %0 = vector.broadcast %cst : f32 to vector<2x18x18xf32>
    %c0 = arith.constant 0 : index
    %c0_0 = arith.constant 0 : index
    %c0_1 = arith.constant 0 : index
    %1 = vector.load %arg6[%c0, %c0_0, %c0_1] : memref<2x18x18xf32, #tpu.memory_space<vmem>>, vector<2x18x18xf32>
    tpu.vector_store %arg6[%c0, %c0_0, %c0_1], %0 {strides = array<i32>} : memref<2x18x18xf32, #tpu.memory_space<vmem>>, vector<2x18x18xf32>,
    %c0_2 = arith.constant 0 : index
    %c0_3 = arith.constant 0 : index
    %c0_4 = arith.constant 0 : index
    %c0_5 = arith.constant 0 : index
    %2 = vector.load %arg1[%c0_2, %c0_3, %c0_4, %c0_5] : memref<2x1x16x16xf32, #tpu.memory_space<vmem>>, vector<2x1x16x16xf32>
    %3 = vector.shape_cast %2 : vector<2x1x16x16xf32> to vector<2x16x16xf32>
    %c0_6 = arith.constant 0 : index
    %c1 = arith.constant 1 : index
    %c1_7 = arith.constant 1 : index
    %4 = vector.load %arg6[%c0_6, %c1, %c1_7] : memref<2x18x18xf32, #tpu.memory_space<vmem>>, vector<2x16x16xf32>
    tpu.vector_store %arg6[%c0_6, %c1, %c1_7], %3 {strides = array<i32>} : memref<2x18x18xf32, #tpu.memory_space<vmem>>, vector<2x16x16xf32>,
    %c0_8 = arith.constant 0 : index
    %c0_9 = arith.constant 0 : index
    %c0_10 = arith.constant 0 : index
    %5 = vector.load %arg6[%c0_8, %c0_9, %c0_10] : memref<2x18x18xf32, #tpu.memory_space<vmem>>, vector<2x16x16xf32>
    %6 = arith.index_cast %arg0 : i32 to index
    %c0_11 = arith.constant 0 : index
    %7 = memref.load %arg2[%6, %c0_11] : memref<4x9xf32, #tpu.memory_space<smem>>
    %8 = vector.broadcast %7 : f32 to vector<2x16x16xf32>
    %9 = arith.mulf %5, %8 : vector<2x16x16xf32>
    %c0_12 = arith.constant 0 : index
    %c0_13 = arith.constant 0 : index
    %c1_14 = arith.constant 1 : index
    %10 = vector.load %arg6[%c0_12, %c0_13, %c1_14] : memref<2x18x18xf32, #tpu.memory_space<vmem>>, vector<2x16x16xf32>
    %11 = arith.index_cast %arg0 : i32 to index
    %c1_15 = arith.constant 1 : index
    %12 = memref.load %arg2[%11, %c1_15] : memref<4x9xf32, #tpu.memory_space<smem>>
    %13 = vector.broadcast %12 : f32 to vector<2x16x16xf32>
    %14 = arith.mulf %10, %13 : vector<2x16x16xf32>
    %15 = arith.addf %9, %14 : vector<2x16x16xf32>
    %c0_16 = arith.constant 0 : index
    %c0_17 = arith.constant 0 : index
    %c2 = arith.constant 2 : index
    %16 = vector.load %arg6[%c0_16, %c0_17, %c2] : memref<2x18x18xf32, #tpu.memory_space<vmem>>, vector<2x16x16xf32>
    %17 = arith.index_cast %arg0 : i32 to index
    %c2_18 = arith.constant 2 : index
    %18 = memref.load %arg2[%17, %c2_18] : memref<4x9xf32, #tpu.memory_space<smem>>
    %19 = vector.broadcast %18 : f32 to vector<2x16x16xf32>
    %20 = arith.mulf %16, %19 : vector<2x16x16xf32>
    %21 = arith.addf %15, %20 : vector<2x16x16xf32>
    %c0_19 = arith.constant 0 : index
    %c1_20 = arith.constant 1 : index
    %c0_21 = arith.constant 0 : index
    %22 = vector.load %arg6[%c0_19, %c1_20, %c0_21] : memref<2x18x18xf32, #tpu.memory_space<vmem>>, vector<2x16x16xf32>
    %23 = arith.index_cast %arg0 : i32 to index
    %c3 = arith.constant 3 : index
    %24 = memref.load %arg2[%23, %c3] : memref<4x9xf32, #tpu.memory_space<smem>>
    %25 = vector.broadcast %24 : f32 to vector<2x16x16xf32>
    %26 = arith.mulf %22, %25 : vector<2x16x16xf32>
    %27 = arith.addf %21, %26 : vector<2x16x16xf32>
    %c0_22 = arith.constant 0 : index
    %c1_23 = arith.constant 1 : index
    %c1_24 = arith.constant 1 : index
    %28 = vector.load %arg6[%c0_22, %c1_23, %c1_24] : memref<2x18x18xf32, #tpu.memory_space<vmem>>, vector<2x16x16xf32>
    %29 = arith.index_cast %arg0 : i32 to index
    %c4 = arith.constant 4 : index
    %30 = memref.load %arg2[%29, %c4] : memref<4x9xf32, #tpu.memory_space<smem>>
    %31 = vector.broadcast %30 : f32 to vector<2x16x16xf32>
    %32 = arith.mulf %28, %31 : vector<2x16x16xf32>
    %33 = arith.addf %27, %32 : vector<2x16x16xf32>
    %c0_25 = arith.constant 0 : index
    %c1_26 = arith.constant 1 : index
    %c2_27 = arith.constant 2 : index
    %34 = vector.load %arg6[%c0_25, %c1_26, %c2_27] : memref<2x18x18xf32, #tpu.memory_space<vmem>>, vector<2x16x16xf32>
    %35 = arith.index_cast %arg0 : i32 to index
    %c5 = arith.constant 5 : index
    %36 = memref.load %arg2[%35, %c5] : memref<4x9xf32, #tpu.memory_space<smem>>
    %37 = vector.broadcast %36 : f32 to vector<2x16x16xf32>
    %38 = arith.mulf %34, %37 : vector<2x16x16xf32>
    %39 = arith.addf %33, %38 : vector<2x16x16xf32>
    %c0_28 = arith.constant 0 : index
    %c2_29 = arith.constant 2 : index
    %c0_30 = arith.constant 0 : index
    %40 = vector.load %arg6[%c0_28, %c2_29, %c0_30] : memref<2x18x18xf32, #tpu.memory_space<vmem>>, vector<2x16x16xf32>
    %41 = arith.index_cast %arg0 : i32 to index
    %c6 = arith.constant 6 : index
    %42 = memref.load %arg2[%41, %c6] : memref<4x9xf32, #tpu.memory_space<smem>>
    %43 = vector.broadcast %42 : f32 to vector<2x16x16xf32>
    %44 = arith.mulf %40, %43 : vector<2x16x16xf32>
    %45 = arith.addf %39, %44 : vector<2x16x16xf32>
    %c0_31 = arith.constant 0 : index
    %c2_32 = arith.constant 2 : index
    %c1_33 = arith.constant 1 : index
    %46 = vector.load %arg6[%c0_31, %c2_32, %c1_33] : memref<2x18x18xf32, #tpu.memory_space<vmem>>, vector<2x16x16xf32>
    %47 = arith.index_cast %arg0 : i32 to index
    %c7 = arith.constant 7 : index
    %48 = memref.load %arg2[%47, %c7] : memref<4x9xf32, #tpu.memory_space<smem>>
    %49 = vector.broadcast %48 : f32 to vector<2x16x16xf32>
    %50 = arith.mulf %46, %49 : vector<2x16x16xf32>
    %51 = arith.addf %45, %50 : vector<2x16x16xf32>
    %c0_34 = arith.constant 0 : index
    %c2_35 = arith.constant 2 : index
    %c2_36 = arith.constant 2 : index
    %52 = vector.load %arg6[%c0_34, %c2_35, %c2_36] : memref<2x18x18xf32, #tpu.memory_space<vmem>>, vector<2x16x16xf32>
    %53 = arith.index_cast %arg0 : i32 to index
    %c8 = arith.constant 8 : index
    %54 = memref.load %arg2[%53, %c8] : memref<4x9xf32, #tpu.memory_space<smem>>
    %55 = vector.broadcast %54 : f32 to vector<2x16x16xf32>
    %56 = arith.mulf %52, %55 : vector<2x16x16xf32>
    %57 = arith.addf %51, %56 : vector<2x16x16xf32>
    %58 = vector.shape_cast %57 : vector<2x16x16xf32> to vector<1x2x16x16xf32>
    %cst_37 = arith.constant dense<0.000000e+00> : vector<1xf32>
    %59 = vector.multi_reduction <add>, %58, %cst_37 [1, 2, 3] : vector<1x2x16x16xf32> to vector<1xf32>
    %60 = vector.shape_cast %59 : vector<1xf32> to vector<1x1x1x1xf32>
    %61 = vector.extract %60[0, 0, 0, 0] : f32 from vector<1x1x1x1xf32>
    %62 = vector.broadcast %61 : f32 to vector<1x1x1xf32>
    %cst_38 = arith.constant 0.001953125 : f32
    %63 = vector.broadcast %cst_38 : f32 to vector<1x1x1xf32>
    %64 = arith.mulf %62, %63 : vector<1x1x1xf32>
    %65 = vector.broadcast %64 : vector<1x1x1xf32> to vector<2x16x16xf32>
    %66 = arith.subf %57, %65 : vector<2x16x16xf32>
    %67 = arith.mulf %66, %66 : vector<2x16x16xf32>
    %68 = vector.shape_cast %67 : vector<2x16x16xf32> to vector<1x2x16x16xf32>
    %cst_39 = arith.constant dense<0.000000e+00> : vector<1xf32>
    %69 = vector.multi_reduction <add>, %68, %cst_39 [1, 2, 3] : vector<1x2x16x16xf32> to vector<1xf32>
    %70 = vector.shape_cast %69 : vector<1xf32> to vector<1x1x1x1xf32>
    %71 = vector.extract %70[0, 0, 0, 0] : f32 from vector<1x1x1x1xf32>
    %72 = vector.broadcast %71 : f32 to vector<1x1x1xf32>
    %cst_40 = arith.constant 0.001953125 : f32
    %73 = vector.broadcast %cst_40 : f32 to vector<1x1x1xf32>
    %74 = arith.mulf %72, %73 : vector<1x1x1xf32>
    %75 = arith.index_cast %arg0 : i32 to index
    %76 = memref.load %arg3[%75] : memref<4xf32, #tpu.memory_space<smem>>
    %cst_41 = arith.constant 9.99999974E-6 : f32
    %77 = vector.broadcast %cst_41 : f32 to vector<1x1x1xf32>
    %78 = arith.addf %74, %77 : vector<1x1x1xf32>
    %79 = math.rsqrt %78 : vector<1x1x1xf32>
    %80 = vector.broadcast %76 : f32 to vector<1x1x1xf32>
    %81 = arith.mulf %80, %79 : vector<1x1x1xf32>
    %82 = vector.broadcast %81 : vector<1x1x1xf32> to vector<2x16x16xf32>
    %83 = arith.mulf %66, %82 : vector<2x16x16xf32>
    %84 = arith.index_cast %arg0 : i32 to index
    %85 = memref.load %arg4[%84] : memref<4xf32, #tpu.memory_space<smem>>
    %86 = vector.broadcast %85 : f32 to vector<2x16x16xf32>
    %87 = arith.addf %83, %86 : vector<2x16x16xf32>
    %cst_42 = arith.constant 0.000000e+00 : f32
    %cst_43 = arith.constant 6.000000e+00 : f32
    %88 = vector.broadcast %cst_42 : f32 to vector<2x16x16xf32>
    %89 = arith.maximumf %88, %87 : vector<2x16x16xf32>
    %90 = vector.broadcast %cst_43 : f32 to vector<2x16x16xf32>
    %91 = arith.minimumf %90, %89 : vector<2x16x16xf32>
    %c0_44 = arith.constant 0 : index
    %c0_45 = arith.constant 0 : index
    %c0_46 = arith.constant 0 : index
    %c0_47 = arith.constant 0 : index
    %92 = vector.load %arg5[%c0_44, %c0_45, %c0_46, %c0_47] : memref<1x2x16x16xf32, #tpu.memory_space<vmem>>, vector<1x2x16x16xf32>
    %93 = vector.shape_cast %92 : vector<1x2x16x16xf32> to vector<2x16x16xf32>
    %94 = vector.shape_cast %91 : vector<2x16x16xf32> to vector<1x2x16x16xf32>
    tpu.vector_store %arg5[%c0_44, %c0_45, %c0_46, %c0_47], %94 {strides = array<i32>} : memref<1x2x16x16xf32, #tpu.memory_space<vmem>>, vector<1x2x16x16xf32>,
    return
  }
  func.func @transform_0(%arg0: i32) -> (i32, i32, i32, i32) {
    %c0_i32 = arith.constant 0 : i32
    %c0_i32_0 = arith.constant 0 : i32
    %c0_i32_1 = arith.constant 0 : i32
    %c0_i32_2 = arith.constant 0 : i32
    return %c0_i32, %arg0, %c0_i32_0, %c0_i32_1 : i32, i32, i32, i32
  }
  func.func @transform_1(%arg0: i32) -> (i32, i32) {
    %c0_i32 = arith.constant 0 : i32
    %c0_i32_0 = arith.constant 0 : i32
    %c0_i32_1 = arith.constant 0 : i32
    return %c0_i32, %c0_i32_0 : i32, i32
  }
  func.func @transform_2(%arg0: i32) -> i32 {
    %c0_i32 = arith.constant 0 : i32
    %c0_i32_0 = arith.constant 0 : i32
    return %c0_i32 : i32
  }
  func.func @transform_3(%arg0: i32) -> i32 {
    %c0_i32 = arith.constant 0 : i32
    %c0_i32_0 = arith.constant 0 : i32
    return %c0_i32 : i32
  }
  func.func @transform_4(%arg0: i32) -> (i32, i32, i32, i32) {
    %c0_i32 = arith.constant 0 : i32
    %c0_i32_0 = arith.constant 0 : i32
    %c0_i32_1 = arith.constant 0 : i32
    %c0_i32_2 = arith.constant 0 : i32
    return %arg0, %c0_i32, %c0_i32_0, %c0_i32_1 : i32, i32, i32, i32
  }
}

</mosaic_0001>

<bundles_post_ra>
// kernel: tpu_custom_call.1
= control target key start
LH: loop header
LB: loop body
LE: loop exit
PB: predicated region body
PF: predicated region fallthrough
CT: control target
= control target key end

     0   :  { %9 = vsyncpa [#allocation4], 0  ;;  %s1292_s0 = inlined_call_operand.hbm [shape: f32[2,4,16,16], index: 0, kind: input, shape index: {}]   ;;  %s1293_s1 = inlined_call_operand.hbm [shape: f32[4,9], index: 1, kind: input, shape index: {}]   ;;  %s1294_s2 = inlined_call_operand.vmem [shape: f32[4], index: 2, kind: input, shape index: {}]   ;;  %s1295_s3 = inlined_call_operand.vmem [shape: f32[4], index: 3, kind: input, shape index: {}]   ;;  %s1296_s4 = inlined_call_operand.hbm [shape: f32[4,2,16,16], index: 4, kind: output, shape index: {}]  }
   0x1   :  { %11 = vsyncpa [#allocation4 + $0x1], 0 }
   0x2   :  { %12 = vsyncpa [#allocation6], 0 }
   0x3   :  { %13 = vsyncpa [#allocation7], 0 }
   0x4   :  { %14 = vsyncpa [#allocation11], 0 }
   0x5   :  { %15 = vsyncpa [#allocation5], 0 }
   0x6   :  { %17 = vsyncpa [#allocation5 + $0x1], 0  ;;  %s994_s15 = smov 0   ;;  %s996_s16 = smov 0  }
   0x7   :  { %s998_s17 = smov 0   ;;  %s1000_s18 = smov 0  }
   0x8 LB: > { %s1015_s19 = sadd.s32 4294967295, %s951_s18   ;;  %s708_s20 = sadd.s32 4294967294, %s951_s18   ;;  %s951_s18 = sphi %s1000_s18, %s1318_s18   ;;  %s947_s17 = sphi %s998_s17, %s1317_s17   ;;  %s943_s16 = sphi %s996_s16, %s1316_s16   ;;  %s939_s15 = sphi %s994_s15, %s1315_s15  }
   0x9   : > { %s1019_s21 = sadd.s32 1, %s951_s18   ;;  %s30_s22 = sadd.s32 1, %s947_s17 }
   0xa   : > { %s27_s23 = ssub.s32 %s951_s18, %s1019_s21  ;;  %p37_p0 = scmp.ne.s32.totalorder %s947_s17, %s943_s16 }
   0xb   : > { %p28_p1 = scmp.eq.s32.totalorder %s27_s23, 0  ;;  %p38_p2 = scmp.eq.s32.totalorder %s951_s18, 0 }
   0xc   : > { %p43_p3 = scmp.ne.s32.totalorder %s943_s16, %s939_s15  ;;  %p1297_p4 = scmp.eq.s32.totalorder %s1015_s19, 0 }
   0xd   : > { %s1031_s24 = scalar_select %p28_p1, %s947_s17, %s30_s22  }
   0xe   : > { %p1033_p5 = por %p38_p2, %p37_p0  ;;  %p1039_p6 = por %p1297_p4, %p43_p3 }
   0xf   : > { %p130_p7 = scmp.eq.s32.totalorder %s1015_s19, 3  ;;  %p136_p8 = scmp.eq.s32.totalorder %s708_s20, 3 }
  0x10   : > { %s1301_s26 = scalar_select %p1039_p6, 1, 0 }
  0x11   : > { %p709_p9 = scmp.ge.s32.totalorder %s951_s18, 1  ;;  %p143_p10 = scmp.lt.s32.totalorder %s951_s18, 5 }
  0x12   : > { %p1046_p11 = por %p130_p7, %p37_p0  ;;  %p1050_p12 = por %p136_p8, %p43_p3 }
  0x13   : > { %p1054_p13 = pnand %p709_p9, %p143_p10  ;;  %s165_s6 = sshll.u32 %s1294_s2, 4  ;;  %s166_s6 = int_to_ptr.vmem [resolvable:$true] %s165_s6 }
  0x14   : > { %s1302_s27 = scalar_select %p1046_p11, 1, 0 }
  0x15   : > { %s1303_s28 = scalar_select %p1050_p12, 1, 0 }
  0x16   : > { %p760_p1 = pneg %p1054_p13  ;;  %s176_s9 = sshll.u32 %s1295_s3, 4  ;;  %s1072_s9 = int_to_ptr.vmem [resolvable:$true] %s176_s9 }
  0x17   : > { %s830_s13 = scalar_lea.hbm %s1293_s1, 64 }
  0x18   : > { %p1068_p0 = pnand %p760_p1, %p1297_p4  ;;  %p831_p2 = scmp.ne.s32.totalorder %s1293_s1, %s830_s13 }
  0x19   : > { %p837_p9 = scmp.lt.u32.totalorder %s830_s13, %s1293_s1 }
  0x1a   : > { %p832_p3 = pneg %p1068_p0 }
  0x1c   : > { %p833_p7 = pnand %p832_p3, %p831_p2 }
  0x1e   : > { %p834_p8 = pneg %p833_p7 }
  0x20   : > { %p839_p10 = pnand %p837_p9, %p834_p8 }
  0x22   : > { %842 = shalt.err (!%p839_p10)
}
  0x23   : > { %s953_s30 = smov [#allocation8]   ;;  %s843_s8 = scalar_lea.vmem %s166_s6, 16 }
  0x24   : > { %763 = dma.hbm_to_smem (!%p1068_p0), %s1293_s1, 64, %s953_s30, [#allocation6]  }
  0x25   : > { %p844_p1 = scmp.ne.s32.totalorder %s166_s6, %s843_s8  ;;  %p851_p4 = scmp.lt.s32.totalorder %s166_s6, %s166_s6 }
  0x26   : > { %p852_p12 = scmp.lt.s32.totalorder %s843_s8, %s843_s8 }
  0x27   : > { %p846_p2 = pnand %p844_p1, %p832_p3 }
  0x28   : > { %p853_p11 = por %p852_p12, %p851_p4 }
  0x29   : > { %p847_p7 = pneg %p846_p2 }
  0x2b   : > { %p854_p6 = pnand %p853_p11, %p847_p7 }
  0x2d   : > { %857 = shalt.err (!%p854_p6)
}
  0x2e   : > { %s954_s11 = smov [#allocation9]   ;;  %s858_s12 = scalar_lea.vmem %s1072_s9, 16 }
  0x2f   : > { %766 = dma.vmem_to_smem (!%p1068_p0), %s166_s6, 16, %s954_s11, [#allocation7]  }
  0x30   : > { %p859_p8 = scmp.ne.s32.totalorder %s1072_s9, %s858_s12  ;;  %p866_p1 = scmp.lt.s32.totalorder %s1072_s9, %s1072_s9 }
  0x31   : > { %p867_p2 = scmp.lt.s32.totalorder %s858_s12, %s858_s12 }
  0x32   : > { %p861_p9 = pnand %p859_p8, %p832_p3 }
  0x33   : > { %p868_p4 = por %p867_p2, %p866_p1 }
  0x34   : > { %p862_p10 = pneg %p861_p9 }
  0x36   : > { %p869_p11 = pnand %p868_p4, %p862_p10 }
  0x38   : > { %872 = shalt.err (!%p869_p11)
}
  0x39   : > { %s955_s13 = smov [#allocation10]   ;;  %p713_p6 = scmp.ge.s32.totalorder %s951_s18, 4 }
  0x3a   : > { %769 = dma.vmem_to_smem (!%p1068_p0), %s1072_s9, 16, %s955_s13, [#allocation11]  }
  0x3b   : > { %183 = sbr.rel (%p713_p6) target bundleno = 79 (0x4f), region = 28 }
  0x42   : > { %s187_s6 = sand.u32 1, %s947_s17   ;;  %s731_s14 = sshll.u32 %s951_s18, 8 }
  0x43   : > { %s714_s20 = sshll.u32 %s187_s6, 5  ;;  %s197_s10 = scalar_lea.hbm %s1292_s0, %s731_s14 }
  0x44   : > { %s743_s9 = scalar_select %p1033_p5, [#allocation0], [#allocation15] }
  0x45   : > { %s191_s30 = scalar_lea.vmem [#allocation3], %s714_s20  ;;  %s956_s8 = smov 1024  }
  0x46   : > { %s210_s5 = sshll.u32 %s191_s30, 4  ;;  %s202_s7 = sld [smem:[%s743_s9]]   ;;  %s211_s5 = int_to_ptr.vmem [resolvable:$true] %s210_s5 }
  0x47   : > { %744 = sst [smem:[#allocation14]] (%p1033_p5), %s956_s8  ;;  %s957_s11 = smov 256  }
  0x48   : > { %745 = sst [smem:[#allocation14 + $0x1]] (%p1033_p5), %s957_s11  ;;  %s958_s12 = smov 2  }
  0x49   : > { %746 = sst [smem:[#allocation14 + $0x2]] (%p1033_p5), %s958_s12  ;;  %s959_s13 = smov 128  }
  0x4a   : > { %747 = sst [smem:[#allocation14 + $0x3]] (%p1033_p5), %s959_s13  ;;  %s960_s20 = smov 8  }
  0x4b   : > { %748 = sst [smem:[#allocation14 + $0x4]] (%p1033_p5), %s959_s13  ;;  %s188_s23 = scalar_lea.sflag [#allocation4], %s187_s6 }
  0x4c   : > { %s717_s14 = sshll.u32 %s202_s7, 26  ;;  %749 = sst [smem:[#allocation14 + $0x5]] (%p1033_p5), %s960_s20 }
  0x4d   : > { %s718_s22 = sadd.s32 134217728, %s717_s14  ;;  %s961_s9 = smov [#allocation13]  }
  0x4e   : > { %750 = dma.general (%p1033_p5), %s197_s10, 512, %s211_s5, %s188_s23, %s961_s9, [#allocation14], %s718_s22, 0  }
  0x4f PF: > { %235 = sbr.rel (%p1054_p13) target bundleno = 857 (0x359), region = 36  ;;  %s1133_s30 = sand.u32 (!%p1054_p13), 1, %s943_s16  }
  0x50   : > { %s720_s7 = sshll.u32 (!%p1054_p13), %s1133_s30, 5  ;;  %s238_s8 = scalar_lea.sflag (!%p1054_p13), [#allocation4], %s1133_s30 }
  0x51   : > { %s241_s11 = scalar_lea.vmem (!%p1054_p13), [#allocation3], %s720_s7  ;;  %p1306_p12 = scmp.ne.s32.totalorder (!%p1054_p13), %s1301_s26, 0 }
  0x56   : > { %918 = dma.done.wait (%p1306_p12), %s238_s8, 512  }
  0x57   : > { %920 = vsyncadd (%p1306_p12), %s238_s8, 4294966784  ;;  %p1307_p5 = scmp.eq.s32.totalorder %s1015_s19, 0 }
  0x59   : > { %922 = dma.done.wait (%p1307_p5), [#allocation6], 64   ;;  %p1308_p13 = pmov %p1307_p5 }
  0x5a   : > { %p1309_p0 = pmov %p1307_p5 }
  0x5b   : > { %924 = vsyncadd (%p1308_p13), [#allocation6], 4294967232 }
  0x5c   : > { %926 = dma.done.wait (%p1309_p0), [#allocation7], 16   ;;  %p1310_p3 = pmov %p1309_p0 }
  0x5d   : > { %p1311_p7 = pmov %p1309_p0 }
  0x5e   : > { %928 = vsyncadd (%p1310_p3), [#allocation7], 4294967280 }
  0x5f   : > { %930 = dma.done.wait (%p1311_p7), [#allocation11], 16   ;;  %p1312_p8 = pmov %p1309_p0 }
  0x61   : > { %932 = vsyncadd (%p1312_p8), [#allocation11], 4294967280 }
  0x62   : > { %258 = sfence }
  0x63   : > { %v287_v0 = vld [vmem:[%s241_s11] sm:$0xff]  ;;  %v289_v1 = vld [vmem:[%s241_s11 + $0x10] sm:$0xff]  ;;  %vm279_vm0 = vcmask 146432   ;;  %s962_s25 = smov 1   ;;  %vm282_vm1 = vcmask 140288   ;;  %v288_v2 = vld [vmem:[%s241_s11 + $0x8] sm:$0xff] }
  0x64   : > { %295 = vrot.lane.b32.xlu0 %v287_v0, %s962_s25  ;;  %299 = vrot.lane.b32.xlu1 %v289_v1, %s962_s25  ;;  %v290_v3 = vld [vmem:[%s241_s11 + $0x18] sm:$0xff]  ;;  %v963_v4 = vmov 0.0   ;;  %s1156_s26 = sshll.u32 %s1015_s19, 7  ;;  %vm307_vm2 = vcmask 138248   ;;  %s964_s23 = smov 127   ;;  %vm515_vm3 = vcmask 130048  }
  0x65   : > { %280 = vst.msk [vmem:[#allocation2] sm:$0xff] %vm279_vm0, %v963_v4  ;;  %281 = vst.msk [vmem:[#allocation2 + $0x8] sm:$0xff] %vm279_vm0, %v963_v4  ;;  %s323_s29 = sadd.s32 1, %s1156_s26  ;;  %s381_s6 = sadd.s32 3, %s1156_s26 }
  0x66   : > { %284 = vst.msk [vmem:[#allocation2 + $0x18] sm:$0xff] %vm279_vm0, %v963_v4  ;;  %285 = vst.msk [vmem:[#allocation2 + $0x20] sm:$0xff] %vm279_vm0, %v963_v4  ;;  %s324_s10 = sld [smem:[#allocation8 + %s323_s29]]  ;;  %s350_s13 = sadd.s32 2, %s1156_s26 }
  0x67   : > { %283 = vst.msk [vmem:[#allocation2 + $0x10] sm:$0x3] %vm282_vm1, %v963_v4  ;;  %286 = vst.msk [vmem:[#allocation2 + $0x28] sm:$0x3] %vm282_vm1, %v963_v4  ;;  %s317_s5 = sld [smem:[#allocation8 + %s1156_s26]]  ;;  %s450_s14 = sadd.s32 6, %s1156_s26 }
  0x68   : > { %297 = vrot.lane.b32.xlu0 %v288_v2, %s962_s25  ;;  %301 = vrot.lane.b32.xlu1 %v290_v3, %s962_s25  ;;  %s382_s12 = sld [smem:[#allocation8 + %s381_s6]]  ;;  %s392_s9 = sadd.s32 4, %s1156_s26 }
  0x69   : > { %s351_s20 = sld [smem:[#allocation8 + %s350_s13]]  ;;  %s965_s11 = smov 126  }
  0x6a   : > { %s451_s22 = sld [smem:[#allocation8 + %s450_s14]]  ;;  %s419_s25 = sadd.s32 5, %s1156_s26 }
  0x6b   : > { %s393_s8 = sld [smem:[#allocation8 + %s392_s9]]  ;;  %s461_s6 = sadd.s32 7, %s1156_s26 }
  0x6c   : > { %v325_v9 = vstv %s324_s10  ;;  %s420_s29 = sld [smem:[#allocation8 + %s419_s25]]  ;;  %p1313_p10 = scmp.ne.s32.totalorder %s1302_s27, 0 }
  0x6d   : > { %v318_v13 = vstv %s317_s5  ;;  %s462_s10 = sld [smem:[#allocation8 + %s461_s6]]  ;;  %s488_s5 = sadd.s32 8, %s1156_s26 }
  0x6e   : > { %v383_v14 = vstv %s382_s12  ;;  %s489_s12 = sld [smem:[#allocation8 + %s488_s5]] }
  0x6f   : > { %v352_v24 = vstv %s351_s20  ;;  %s560_s14 = sld [smem:[#allocation9 + %s1015_s19]] }
  0x70   : > { %v452_v31 = vstv %s451_s22  ;;  %s569_s20 = sld [smem:[#allocation10 + %s1015_s19]]  ;;  %s732_s22 = sshll.u32 %s1015_s19, 9 }
  0x71   : > { %v394_v45 = vstv %s393_s8  ;;  %s1243_s25 = scalar_lea.hbm %s1296_s4, %s732_s22  ;;  %s588_s19 = scalar_lea.sflag [#allocation5], %s1133_s30 }
  0x72   : > { %v421_v50 = vstv %s420_s29  ;;  %s966_s29 = smov [#allocation12]  }
  0x73   : > { %v463_v55 = vstv %s462_s10  ;;  %s877_s6 = sshll.u32 %s966_s29, 4  ;;  %s878_s6 = int_to_ptr.vmem [resolvable:$false] %s877_s6 }
  0x74   : > { %v490_v60 = vstv %s489_s12  ;;  %s879_s10 = scalar_lea.vmem %s878_s6, 1024 }
  0xd6   : > { %v296_v5 = vpop.permute.xlu0 %295  ;;  %v300_v6 = vpop.permute.xlu1 %299 }
  0xd7   : > { %308 = vst.msk [vmem:[#allocation2 + $0x1] sm:$0xff] %vm307_vm2, %v296_v5  ;;  %310 = vst.msk [vmem:[#allocation2 + $0x19] sm:$0xff] %vm307_vm2, %v300_v6 }
  0xda   : > { %v298_v7 = vpop.permute.xlu0 %297  ;;  %v302_v8 = vpop.permute.xlu1 %301 }
  0xdb   : > { %309 = vst.msk [vmem:[#allocation2 + $0x9] sm:$0xff] %vm307_vm2, %v298_v7  ;;  %311 = vst.msk [vmem:[#allocation2 + $0x21] sm:$0xff] %vm307_vm2, %v302_v8 }
  0xde   : > { %v312_v10 = vld [vmem:[#allocation2] sm:$0xff]  ;;  %v314_v11 = vld [vmem:[#allocation2 + $0x18] sm:$0xff] }
  0xdf   : > { %v377_v12 = vld [vmem:[#allocation2 + $0x1] sm:$0xff]  ;;  %v326_v15 = vmul.f32 %v325_v9, %v312_v10  ;;  %v379_v16 = vld [vmem:[#allocation2 + $0x19] sm:$0xff]  ;;  %v328_v17 = vmul.f32 %v325_v9, %v314_v11  ;;  %v1165_v18 = vmul.f32 %v318_v13, %v312_v10  ;;  %v1167_v19 = vmul.f32 %v318_v13, %v314_v11 }
  0xe0   : > { %v1169_v20 = vmul.f32 %v383_v14, %v377_v12  ;;  %v1171_v21 = vmul.f32 %v383_v14, %v379_v16  ;;  %v353_v32 = vmul.f32 %v352_v24, %v312_v10  ;;  %v355_v44 = vmul.f32 %v352_v24, %v314_v11 }
  0xe1   : > { %334 = vrot.lane.b32.xlu0 %v326_v15, %s964_s23  ;;  %v395_v47 = vmul.f32 %v394_v45, %v377_v12  ;;  %v397_v49 = vmul.f32 %v394_v45, %v379_v16  ;;  %v422_v51 = vmul.f32 %v421_v50, %v377_v12  ;;  %v424_v54 = vmul.f32 %v421_v50, %v379_v16 }
  0xe2   : > { %v313_v22 = vld [vmem:[#allocation2 + $0x8] sm:$0xff]  ;;  %v315_v25 = vld [vmem:[#allocation2 + $0x20] sm:$0xff] }
  0xe3   : > { %v327_v23 = vmul.f32 %v325_v9, %v313_v22  ;;  %v378_v26 = vld [vmem:[#allocation2 + $0x9] sm:$0xff]  ;;  %v380_v27 = vld [vmem:[#allocation2 + $0x21] sm:$0xff]  ;;  %v354_v34 = vmul.f32 %v352_v24, %v313_v22  ;;  %v1175_v35 = vmul.f32 %v318_v13, %v313_v22  ;;  %v1177_v36 = vmul.f32 %v318_v13, %v315_v25 }
  0xe4   : > { %v446_v28 = vld [vmem:[#allocation2 + $0x2] sm:$0xff]  ;;  %v447_v29 = vld [vmem:[#allocation2 + $0xa] sm:$0xff]  ;;  %v448_v30 = vld [vmem:[#allocation2 + $0x1a] sm:$0xff]  ;;  %v1179_v37 = vmul.f32 %v383_v14, %v378_v26  ;;  %v1181_v38 = vmul.f32 %v383_v14, %v380_v27  ;;  %v329_v43 = vmul.f32 %v325_v9, %v315_v25  ;;  %v356_v46 = vmul.f32 %v352_v24, %v315_v25 }
  0xe5   : > { %336 = vrot.lane.b32.xlu1 %v327_v23, %s964_s23  ;;  %338 = vrot.lane.b32.xlu0 %v328_v17, %s964_s23  ;;  %v449_v33 = vld [vmem:[#allocation2 + $0x22] sm:$0xff]  ;;  %v1183_v39 = vmul.f32 %v452_v31, %v446_v28  ;;  %v1185_v40 = vmul.f32 %v452_v31, %v447_v29  ;;  %v1187_v41 = vmul.f32 %v452_v31, %v448_v30 }
  0xe6   : > { %v1192_v42 = vmul.f32 %v452_v31, %v449_v33  ;;  %v396_v48 = vmul.f32 %v394_v45, %v378_v26  ;;  %v423_v52 = vmul.f32 %v421_v50, %v378_v26  ;;  %v398_v53 = vmul.f32 %v394_v45, %v380_v27 }
  0xe7   : > { %v425_v56 = vmul.f32 %v421_v50, %v380_v27  ;;  %v464_v57 = vmul.f32 %v463_v55, %v446_v28  ;;  %v465_v58 = vmul.f32 %v463_v55, %v447_v29  ;;  %v466_v59 = vmul.f32 %v463_v55, %v448_v30 }
  0xe8   : > { %v491_v61 = vmul.f32 %v490_v60, %v446_v28  ;;  %v492_v62 = vmul.f32 %v490_v60, %v447_v29  ;;  %v467_v63 = vmul.f32 %v463_v55, %v449_v33  ;;  %v493_v0 = vmul.f32 %v490_v60, %v448_v30 }
  0xe9   : > { %361 = vrot.lane.b32.xlu1 %v353_v32, %s965_s11  ;;  %363 = vrot.lane.b32.xlu0 %v354_v34, %s965_s11  ;;  %v494_v1 = vmul.f32 %v490_v60, %v449_v33 }
  0xed   : > { %340 = vrot.lane.b32.xlu1 %v329_v43, %s964_s23  ;;  %365 = vrot.lane.b32.xlu0 %v355_v44, %s965_s11 }
  0xf1   : > { %367 = vrot.lane.b32.xlu1 %v356_v46, %s965_s11  ;;  %403 = vrot.lane.b32.xlu0 %v395_v47, %s964_s23 }
  0xf5   : > { %405 = vrot.lane.b32.xlu1 %v396_v48, %s964_s23  ;;  %407 = vrot.lane.b32.xlu0 %v397_v49, %s964_s23 }
  0xf9   : > { %430 = vrot.lane.b32.xlu1 %v422_v51, %s965_s11  ;;  %432 = vrot.lane.b32.xlu0 %v423_v52, %s965_s11 }
  0xfd   : > { %409 = vrot.lane.b32.xlu1 %v398_v53, %s964_s23  ;;  %434 = vrot.lane.b32.xlu0 %v424_v54, %s965_s11 }
 0x101   : > { %436 = vrot.lane.b32.xlu1 %v425_v56, %s965_s11  ;;  %472 = vrot.lane.b32.xlu0 %v464_v57, %s964_s23 }
 0x105   : > { %474 = vrot.lane.b32.xlu1 %v465_v58, %s964_s23  ;;  %476 = vrot.lane.b32.xlu0 %v466_v59, %s964_s23 }
 0x109   : > { %499 = vrot.lane.b32.xlu1 %v491_v61, %s965_s11  ;;  %501 = vrot.lane.b32.xlu0 %v492_v62, %s965_s11 }
 0x10d   : > { %478 = vrot.lane.b32.xlu1 %v467_v63, %s964_s23  ;;  %503 = vrot.lane.b32.xlu0 %v493_v0, %s965_s11  ;;  %s278_s23 = scalar_lea.vmem [#allocation12], %s720_s7 }
 0x10e   : > { %s601_s9 = sshll.u32 %s278_s23, 4  ;;  %s1245_s9 = int_to_ptr.vmem [resolvable:$true] %s601_s9 }
 0x10f   : > { %s873_s7 = scalar_lea.vmem %s1245_s9, 512  ;;  %p880_p4 = scmp.lt.s32.totalorder %s1245_s9, %s878_s6 }
 0x110   : > { %p874_p9 = scmp.ne.s32.totalorder %s1245_s9, %s873_s7  ;;  %p881_p11 = scmp.lt.s32.totalorder %s879_s10, %s873_s7 }
 0x111   : > { %505 = vrot.lane.b32.xlu1 %v494_v1, %s965_s11 }
 0x112   : > { %p875_p1 = pnand %p874_p9, %p1313_p10  ;;  %p882_p6 = por %p881_p11, %p880_p4 }
 0x114   : > { %p876_p2 = pneg %p875_p1 }
 0x116   : > { %p883_p12 = pnand %p882_p6, %p876_p2 }
 0x153   : > { %v335_v2 = vpop.permute.xlu0 %334 }
 0x154   : > { %v346_v5 = vadd.f32 %v335_v2, %v1165_v18 }
 0x157   : > { %v337_v3 = vpop.permute.xlu1 %336  ;;  %v339_v4 = vpop.permute.xlu0 %338 }
 0x158   : > { %v347_v6 = vadd.f32 %v337_v3, %v1175_v35  ;;  %v348_v11 = vadd.f32 %v339_v4, %v1167_v19 }
 0x15b   : > { %v362_v7 = vpop.permute.xlu1 %361  ;;  %v364_v8 = vpop.permute.xlu0 %363 }
 0x15c   : > { %v373_v9 = vadd.f32 %v362_v7, %v346_v5  ;;  %v374_v10 = vadd.f32 %v364_v8, %v347_v6 }
 0x15e   : > { %v388_v12 = vadd.f32 %v1169_v20, %v373_v9  ;;  %v389_v13 = vadd.f32 %v1179_v37, %v374_v10 }
 0x15f   : > { %v341_v14 = vpop.permute.xlu1 %340  ;;  %v366_v15 = vpop.permute.xlu0 %365 }
 0x160   : > { %v375_v16 = vadd.f32 %v366_v15, %v348_v11  ;;  %v349_v17 = vadd.f32 %v341_v14, %v1177_v36 }
 0x162   : > { %v390_v22 = vadd.f32 %v1171_v21, %v375_v16 }
 0x163   : > { %v368_v18 = vpop.permute.xlu1 %367  ;;  %v404_v23 = vpop.permute.xlu0 %403 }
 0x164   : > { %v376_v24 = vadd.f32 %v368_v18, %v349_v17  ;;  %v415_v28 = vadd.f32 %v404_v23, %v388_v12 }
 0x166   : > { %v391_v25 = vadd.f32 %v1181_v38, %v376_v24 }
 0x167   : > { %v406_v26 = vpop.permute.xlu1 %405  ;;  %v408_v27 = vpop.permute.xlu0 %407 }
 0x168   : > { %v416_v19 = vadd.f32 %v406_v26, %v389_v13  ;;  %v417_v32 = vadd.f32 %v408_v27, %v390_v22 }
 0x16b   : > { %v431_v29 = vpop.permute.xlu1 %430  ;;  %v433_v20 = vpop.permute.xlu0 %432 }
 0x16c   : > { %v442_v30 = vadd.f32 %v431_v29, %v415_v28  ;;  %v443_v31 = vadd.f32 %v433_v20, %v416_v19 }
 0x16e   : > { %v457_v33 = vadd.f32 %v1183_v39, %v442_v30  ;;  %v458_v34 = vadd.f32 %v1185_v40, %v443_v31 }
 0x16f   : > { %v410_v35 = vpop.permute.xlu1 %409  ;;  %v435_v21 = vpop.permute.xlu0 %434 }
 0x170   : > { %v444_v36 = vadd.f32 %v435_v21, %v417_v32  ;;  %v418_v37 = vadd.f32 %v410_v35, %v391_v25  ;;  %v563_v21 = vstv %s560_s14 }
 0x172   : > { %v459_v43 = vadd.f32 %v1187_v41, %v444_v36 }
 0x173   : > { %v437_v38 = vpop.permute.xlu1 %436  ;;  %v473_v44 = vpop.permute.xlu0 %472 }
 0x174   : > { %v445_v45 = vadd.f32 %v437_v38, %v418_v37  ;;  %v484_v49 = vadd.f32 %v473_v44, %v457_v33 }
 0x176   : > { %v460_v46 = vadd.f32 %v1192_v42, %v445_v45 }
 0x177   : > { %v475_v47 = vpop.permute.xlu1 %474  ;;  %v477_v48 = vpop.permute.xlu0 %476 }
 0x178   : > { %v485_v50 = vadd.f32 %v475_v47, %v458_v34  ;;  %v486_v40 = vadd.f32 %v477_v48, %v459_v43  ;;  %v570_v43 = vstv %s569_s20 }
 0x17b   : > { %v500_v51 = vpop.permute.xlu1 %499  ;;  %v502_v52 = vpop.permute.xlu0 %501 }
 0x17c   : > { %v511_v39 = vadd.f32 %v500_v51, %v484_v49  ;;  %v512_v53 = vadd.f32 %v502_v52, %v485_v50 }
 0x17e   : > { %v516_v56 = vsel %vm515_vm3, %v511_v39, 0.0  ;;  %v517_v41 = vsel %vm515_vm3, %v512_v53, 0.0 }
 0x17f   : > { %v479_v54 = vpop.permute.xlu1 %478  ;;  %v504_v55 = vpop.permute.xlu0 %503  ;;  %v518_v59 = vadd.f32 %v517_v41, %v516_v56 }
 0x180   : > { %v513_v57 = vadd.f32 %v504_v55, %v486_v40  ;;  %v487_v58 = vadd.f32 %v479_v54, %v460_v46 }
 0x182   : > { %v519_v42 = vsel %vm515_vm3, %v513_v57, 0.0 }
 0x183   : > { %v506_v60 = vpop.permute.xlu1 %505  ;;  %v520_v62 = vadd.f32 %v519_v42, %v518_v59 }
 0x184   : > { %v514_v61 = vadd.f32 %v506_v60, %v487_v58 }
 0x186   : > { %v521_v63 = vsel %vm515_vm3, %v514_v61, 0.0 }
 0x187   : > { %v522_v0 = vadd.f32 %v521_v63, %v520_v62 }
 0x189   : > { %523 = vadd.xlane.f32.xlu0 %v522_v0 }
 0x216   : > { %v524_v1 = vpop.xlane.xlu0 %523 }
 0x217   : > { %v525_v2 = vrot.slane %v524_v1, 4 }
 0x219   : > { %v526_v3 = vadd.f32 %v525_v2, %v524_v1 }
 0x21b   : > { %v527_v4 = vrot.slane %v526_v3, 2 }
 0x21d   : > { %v528_v5 = vadd.f32 %v527_v4, %v526_v3 }
 0x21f   : > { %v529_v6 = vrot.slane %v528_v5, 1 }
 0x221   : > { %v530_v7 = vadd.f32 %v529_v6, %v528_v5 }
 0x223   : > { %733 = vpush %v530_v7 }
 0x254   : > { %s734_s26 = spop %733 }
 0x255   : > { %v532_v8 = vstv %s734_s26 }
 0x256   : > { %v533_v9 = vmul.f32 0.001953125, %v532_v8 }
 0x258   : > { %v534_v10 = vsub.f32 %v511_v39, %v533_v9  ;;  %v535_v11 = vsub.f32 %v512_v53, %v533_v9  ;;  %v536_v12 = vsub.f32 %v513_v57, %v533_v9  ;;  %v537_v13 = vsub.f32 %v514_v61, %v533_v9 }
 0x25a   : > { %v538_v14 = vmul.f32 %v534_v10, %v534_v10  ;;  %v539_v15 = vmul.f32 %v535_v11, %v535_v11  ;;  %v540_v16 = vmul.f32 %v536_v12, %v536_v12  ;;  %v541_v17 = vmul.f32 %v537_v13, %v537_v13 }
 0x25c   : > { %v542_v22 = vsel %vm515_vm3, %v538_v14, 0.0  ;;  %v543_v18 = vsel %vm515_vm3, %v539_v15, 0.0  ;;  %v545_v24 = vsel %vm515_vm3, %v540_v16, 0.0  ;;  %v547_v26 = vsel %vm515_vm3, %v541_v17, 0.0 }
 0x25d   : > { %v544_v23 = vadd.f32 %v543_v18, %v542_v22 }
 0x25f   : > { %v546_v25 = vadd.f32 %v545_v24, %v544_v23 }
 0x261   : > { %v548_v27 = vadd.f32 %v547_v26, %v546_v25 }
 0x263   : > { %549 = vadd.xlane.f32.xlu1 %v548_v27 }
 0x2f0   : > { %v550_v28 = vpop.xlane.xlu1 %549 }
 0x2f1   : > { %v551_v19 = vrot.slane %v550_v28, 4 }
 0x2f3   : > { %v552_v29 = vadd.f32 %v551_v19, %v550_v28 }
 0x2f5   : > { %v553_v20 = vrot.slane %v552_v29, 2 }
 0x2f7   : > { %v554_v30 = vadd.f32 %v553_v20, %v552_v29 }
 0x2f9   : > { %v555_v31 = vrot.slane %v554_v30, 1 }
 0x2fb   : > { %v556_v32 = vadd.f32 %v555_v31, %v554_v30 }
 0x2fd   : > { %735 = vpush %v556_v32 }
 0x32e   : > { %s736_s13 = spop %735 }
 0x32f   : > { %v558_v33 = vstv %s736_s13 }
 0x330   : > { %v559_v34 = vmul.f32 0.001953125, %v558_v33 }
 0x332   : > { %v561_v35 = vadd.f32 1e-05, %v559_v34 }
 0x334   : > { %828 = vrsqrt.f32 %v561_v35 }
 0x33e   : > { %v829_v36 = vpop.eup %828 }
 0x33f   : > { %v564_v37 = vmul.f32 %v829_v36, %v563_v21 }
 0x341   : > { %v565_v38 = vmul.f32 %v564_v37, %v534_v10  ;;  %v566_v44 = vmul.f32 %v564_v37, %v535_v11  ;;  %v567_v45 = vmul.f32 %v564_v37, %v536_v12  ;;  %v568_v46 = vmul.f32 %v564_v37, %v537_v13 }
 0x343   : > { %v571_v47 = vadd.f32 %v570_v43, %v565_v38  ;;  %v572_v48 = vadd.f32 %v570_v43, %v566_v44  ;;  %v573_v49 = vadd.f32 %v570_v43, %v567_v45  ;;  %v574_v50 = vadd.f32 %v570_v43, %v568_v46 }
 0x345   : > { %v575_v51 = vmax.f32 %v571_v47, 0.0  ;;  %v576_v52 = vmax.f32 %v572_v48, 0.0  ;;  %v577_v39 = vmax.f32 %v573_v49, 0.0  ;;  %v578_v53 = vmax.f32 %v574_v50, 0.0 }
 0x347   : > { %v579_v40 = vmin.f32 %v575_v51, 6.0  ;;  %v580_v54 = vmin.f32 %v576_v52, 6.0  ;;  %v581_v55 = vmin.f32 %v577_v39, 6.0  ;;  %v582_v56 = vmin.f32 %v578_v53, 6.0 }
 0x349   : > { %583 = vst.msk [vmem:[%s278_s23] sm:$0xff] %vm515_vm3, %v579_v40  ;;  %584 = vst.msk [vmem:[%s278_s23 + $0x8] sm:$0xff] %vm515_vm3, %v580_v54 }
 0x34a   : > { %585 = vst.msk [vmem:[%s278_s23 + $0x10] sm:$0xff] %vm515_vm3, %v581_v55  ;;  %586 = vst.msk [vmem:[%s278_s23 + $0x18] sm:$0xff] %vm515_vm3, %v582_v56 }
 0x34b   : > { %886 = shalt.err (!%p883_p12)
}
 0x34c   : > { %s887_s5 = scalar_lea.hbm %s1243_s25, 512  ;;  %s891_s13 = scalar_lea.hbm %s1296_s4, 2048 }
 0x34d   : > { %p888_p5 = scmp.ne.s32.totalorder %s1243_s25, %s887_s5  ;;  %p892_p3 = scmp.lt.u32.totalorder %s1243_s25, %s1296_s4 }
 0x34e   : > { %p893_p7 = scmp.lt.u32.totalorder %s891_s13, %s887_s5  ;;  %p895_p9 = scmp.lt.u32.totalorder %s887_s5, %s1243_s25 }
 0x34f   : > { %p889_p13 = pnand %p888_p5, %p1313_p10 }
 0x350   : > { %p894_p8 = por %p893_p7, %p892_p3 }
 0x351   : > { %p890_p0 = pneg %p889_p13 }
 0x352   : > { %p896_p1 = por %p895_p9, %p894_p8 }
 0x354   : > { %p897_p2 = pnand %p896_p1, %p890_p0 }
 0x356   : > { %900 = shalt.err (!%p897_p2)
}
 0x357   : > { %s967_s22 = smov 128   ;;  %s968_s23 = smov 8  }
 0x358   : > { %758 = dma.vmem_to_hbm [thread:$0]  (%p1313_p10), %s1245_s9, 512, %s1243_s25, %s588_s19, %s967_s22, %s967_s22, %s968_s23  }
 0x359 PF: > { %p780_p4 = scmp.ge.s32.totalorder %s951_s18, 2  ;;  %s616_s8 = sand.u32 1, %s939_s15  }
 0x35a   : > { %p1314_p11 = scmp.ne.s32.totalorder %s1303_s28, 0  ;;  %s617_s11 = scalar_lea.sflag [#allocation5], %s616_s8 }
 0x35c   : > { %p771_p6 = pnand %p780_p4, %p1314_p11 }
 0x35e   : > { %934 = dma.done.wait (!%p771_p6), %s617_s11, 512  }
 0x35f   : > { %936 = vsyncadd (!%p771_p6), %s617_s11, 4294966784  ;;  %p20_p12 = scmp.ge.s32.totalorder %s1019_s21, 6   ;;  %s1315_s15 = smov %s943_s16 }
 0x360   : > { %s1316_s16 = smov %s947_s17  ;;  %s1317_s17 = smov %s1031_s24 }
 0x361   : > { %s1318_s18 = smov %s1019_s21  ;;  %22 = sbr.rel (!%p20_p12) target bundleno = 8 (0x8), region = 100 }
 0x368   :  { %622 = vsyncpa [#allocation4], 1 }
 0x369   :  { %624 = vsyncpa [#allocation4 + $0x1], 1 }
 0x36a   :  { %625 = vsyncpa [#allocation5], 1 }
 0x36b   :  { %627 = vsyncpa [#allocation5 + $0x1], 1 }
 0x36c   :  { %628 = vsyncpa [#allocation6], 1 }
 0x36d   :  { %630 = vsyncpa [#allocation6 + $0x1], 1 }
 0x36e   :  { %631 = vsyncpa [#allocation7], 1 }
 0x36f   :  { %633 = vsyncpa [#allocation7 + $0x1], 1 }
 0x370   :  { %634 = vsyncpa [#allocation11], 1 }

</bundles_post_ra>
